<compile_context>
chip_gen: v7x
topology: tpu7x:2x2x1
jax: 0.10.0
libtpu: 0.0.40
codegen_flags: <defaults>
</compile_context>

<pallas_src>
import functools

import jax
import jax.numpy as jnp
from jax.experimental import pallas as pl
from jax.experimental.pallas import tpu as pltpu


def _round_up(x: int, m: int) -> int:
    return ((x + m - 1) // m) * m


def actor_forward_kernel(x_ref, w1_ref, b1_ref, w2_ref, b2_ref, pi_ref):
    # fc1: x @ W1 + b1  (bf16 MXU inputs, f32 accumulate), ReLU in f32.
    h = jnp.dot(x_ref[...], w1_ref[...],
                preferred_element_type=jnp.float32) + b1_ref[...]
    h = jnp.maximum(h, 0.0)

    # pi head: h @ W2 + b2 (bf16 MXU inputs, f32 accumulate).
    logits = jnp.dot(h.astype(jnp.bfloat16), w2_ref[...],
                     preferred_element_type=jnp.float32) + b2_ref[...]

    # Numerically-stable softmax over the feature axis (== torch dim=1), f32.
    # Padded action columns have bias -1e30 (f32!) -> exp(...) == 0 -> prob 0.
    m = jnp.max(logits, axis=-1, keepdims=True)
    e = jnp.exp(logits - m)
    denom = jnp.sum(e, axis=-1, keepdims=True)
    pi_ref[...] = (e / denom).astype(pi_ref.dtype)   # exact normalize (free)


def prepare_actor_params(w1, b1, w2, b2):
    """One-time (init / param-update) weight preparation -- NOT per forward.

    w1: (K, H)  b1: (1, H)  w2: (H, N)  b2: (1, N)   ((in, out) layout)

    * K (input_dims) is left at its native size (no 32->128 HBM padding).
    * H and N are padded to the 128-lane width for full-width, lane-dense
      MXU passes and unmasked output stores.
    * weights -> bf16; biases -> f32.  Padded columns of the pi head get a
      -1e30 f32 bias so their softmax probability is exactly 0.
    """
    K, H = w1.shape
    N = w2.shape[1]
    Hp, Np = _round_up(H, 128), _round_up(N, 128)

    w1p = jnp.zeros((K, Hp), jnp.bfloat16).at[:, :H].set(w1.astype(jnp.bfloat16))
    b1p = jnp.zeros((1, Hp), jnp.float32).at[:, :H].set(b1.astype(jnp.float32))
    w2p = jnp.zeros((Hp, Np), jnp.bfloat16).at[:H, :N].set(w2.astype(jnp.bfloat16))
    b2p = jnp.full((1, Np), -1e30, jnp.float32).at[:, :N].set(b2.astype(jnp.float32))
    return w1p, b1p, w2p, b2p


@functools.partial(jax.jit, static_argnames=("n_actions", "block_b"))
def actor_forward(state, w1p, b1p, w2p, b2p, *, n_actions, block_b=1024):
    """Forward pass of ActorNetwork.

    state: (B, input_dims) f32
    w1p/b1p/w2p/b2p: pre-padded params from prepare_actor_params (call once).
    returns pi: (B, n_actions) f32, rows sum to 1.
    """
    B, K = state.shape
    Hp = w1p.shape[1]
    Np = w2p.shape[1]

    # Batch tiling: multiples of 16 (bf16 sublane pack).  If the whole batch
    # fits in one tile but is reasonably large, split into 2 grid steps so the
    # "parallel" axis can shard across both v7x TensorCores.
    b16 = _round_up(max(B, 1), 16)
    tb = min(block_b, b16)
    if b16 >= 128 and b16 <= block_b:
        tb = _round_up((b16 + 1) // 2, 16)
    Bp = _round_up(b16, tb)

    # Cast to bf16 (halves the dominant input stream); pad only along B.
    xb = state.astype(jnp.bfloat16)
    if Bp != B:
        xb = jnp.pad(xb, ((0, Bp - B), (0, 0)))

    resident = lambda a: pl.BlockSpec(a.shape, lambda i: (0, 0))  # stays in VMEM

    pi_padded = pl.pallas_call(
        actor_forward_kernel,
        out_shape=jax.ShapeDtypeStruct((Bp, Np), jnp.bfloat16),  # lane-dense bf16
        grid=(Bp // tb,),
        in_specs=[
            pl.BlockSpec((tb, K), lambda i: (i, 0)),   # x: tiled along B, native K
            resident(w1p),
            resident(b1p),
            resident(w2p),
            resident(b2p),
        ],
        out_specs=pl.BlockSpec((tb, Np), lambda i: (i, 0)),
        compiler_params=pltpu.CompilerParams(
            dimension_semantics=("parallel",)),        # shard B across TCs (v7x)
    )(xb, w1p, b1p, w2p, b2p)

    return pi_padded[:B, :n_actions].astype(jnp.float32)


def init_actor_params(key, input_dims, fc1_dims, n_actions):
    """Deterministic init mirroring nn.Linear default: U(-1/sqrt(fan_in), +).
    Weights stored already transposed to (in, out)."""
    k1, k2, k3, k4 = jax.random.split(key, 4)
    lim1 = 1.0 / jnp.sqrt(jnp.float32(input_dims))
    lim2 = 1.0 / jnp.sqrt(jnp.float32(fc1_dims))
    w1 = jax.random.uniform(k1, (input_dims, fc1_dims), jnp.float32, -lim1, lim1)
    b1 = jax.random.uniform(k2, (1, fc1_dims), jnp.float32, -lim1, lim1)
    w2 = jax.random.uniform(k3, (fc1_dims, n_actions), jnp.float32, -lim2, lim2)
    b2 = jax.random.uniform(k4, (1, n_actions), jnp.float32, -lim2, lim2)
    return w1, b1, w2, b2


if __name__ == "__main__":
    # Small shapes consistent with ActorNetwork(alpha, input_dims, fc1_dims, ...).
    B, input_dims, fc1_dims, n_actions = 8, 32, 64, 16

    key = jax.random.PRNGKey(0)
    k_state, k_params = jax.random.split(key)
    state = jax.random.normal(k_state, (B, input_dims), jnp.float32)
    w1, b1, w2, b2 = init_actor_params(k_params, input_dims, fc1_dims, n_actions)

    # One-time param prep (hoisted out of the per-call hot path).
    w1p, b1p, w2p, b2p = prepare_actor_params(w1, b1, w2, b2)

    pi = actor_forward(state, w1p, b1p, w2p, b2p, n_actions=n_actions)
    pi = jax.block_until_ready(pi)
    assert pi.shape == (B, n_actions)

    # Reference 1: same math, bf16 matmul inputs / f32 accumulate (tight-ish;
    # allows for the bf16 output store quantization).
    h_bf = jnp.maximum(
        jnp.dot(state.astype(jnp.bfloat16), w1.astype(jnp.bfloat16),
                preferred_element_type=jnp.float32) + b1, 0.0)
    logits_bf = jnp.dot(h_bf.astype(jnp.bfloat16), w2.astype(jnp.bfloat16),
                        preferred_element_type=jnp.float32) + b2
    pi_ref_bf = jax.nn.softmax(logits_bf, axis=1)
    assert jnp.allclose(pi, pi_ref_bf, atol=5e-3, rtol=5e-3)

    # Reference 2: pure f32 PyTorch-equivalent forward (loose check for bf16).
    pi_ref_f32 = jax.nn.softmax(jnp.maximum(state @ w1 + b1, 0.0) @ w2 + b2, axis=1)
    assert jnp.allclose(pi, pi_ref_f32, atol=1.5e-2, rtol=1.5e-2)

    # Rows sum to 1 (exact divide in-kernel; bf16 output quantization only).
    assert jnp.allclose(jnp.sum(pi, axis=1), 1.0, atol=1e-2)

    print("KERNEL_OK")
</pallas_src>

<mosaic_0001>
module attributes {stable_mosaic.version = 11 : i64} {
  func.func @actor_forward_kernel(%arg0: i32, %arg1: memref<16x32xbf16, #tpu.memory_space<vmem>>, %arg2: memref<32x128xbf16, #tpu.memory_space<vmem>>, %arg3: memref<1x128xf32, #tpu.memory_space<vmem>>, %arg4: memref<128x128xbf16, #tpu.memory_space<vmem>>, %arg5: memref<1x128xf32, #tpu.memory_space<vmem>>, %arg6: memref<16x128xbf16, #tpu.memory_space<vmem>>) attributes {dimension_semantics = [#tpu.dimension_semantics<parallel>], iteration_bounds = array<i64: 1>, scalar_prefetch = 0 : i64, scratch_operands = 0 : i64, tpu.core_type = #tpu.core_type<tc>, window_params = [{transform_indices = @transform_0, window_bounds = array<i64: 16, 32>}, {pipeline_mode = #tpu.pipeline_mode<synchronous>, transform_indices = @transform_1, window_bounds = array<i64: 32, 128>}, {pipeline_mode = #tpu.pipeline_mode<synchronous>, transform_indices = @transform_2, window_bounds = array<i64: 1, 128>}, {pipeline_mode = #tpu.pipeline_mode<synchronous>, transform_indices = @transform_3, window_bounds = array<i64: 128, 128>}, {pipeline_mode = #tpu.pipeline_mode<synchronous>, transform_indices = @transform_4, window_bounds = array<i64: 1, 128>}, {transform_indices = @transform_5, window_bounds = array<i64: 16, 128>}]} {
    %c0 = arith.constant 0 : index
    %c0_0 = arith.constant 0 : index
    %0 = vector.load %arg1[%c0, %c0_0] : memref<16x32xbf16, #tpu.memory_space<vmem>>, vector<16x32xbf16>
    %c0_1 = arith.constant 0 : index
    %c0_2 = arith.constant 0 : index
    %1 = vector.load %arg2[%c0_1, %c0_2] : memref<32x128xbf16, #tpu.memory_space<vmem>>, vector<32x128xbf16>
    %cst = arith.constant dense<0.000000e+00> : vector<16x128xf32>
    %2 = tpu.matmul %0, %1, %cst {dimension_numbers = #tpu.dot_dimension_numbers<[1], [0], [0], [1], [0, 0, 1, 1], [], []>} : vector<16x32xbf16>, vector<32x128xbf16>, vector<16x128xf32> -> vector<16x128xf32>
    %c0_3 = arith.constant 0 : index
    %c0_4 = arith.constant 0 : index
    %3 = vector.load %arg3[%c0_3, %c0_4] : memref<1x128xf32, #tpu.memory_space<vmem>>, vector<1x128xf32>
    %4 = vector.broadcast %3 : vector<1x128xf32> to vector<16x128xf32>
    %5 = arith.addf %2, %4 : vector<16x128xf32>
    %cst_5 = arith.constant 0.000000e+00 : f32
    %6 = vector.broadcast %cst_5 : f32 to vector<16x128xf32>
    %7 = arith.maximumf %5, %6 : vector<16x128xf32>
    %8 = arith.truncf %7 : vector<16x128xf32> to vector<16x128xbf16>
    %c0_6 = arith.constant 0 : index
    %c0_7 = arith.constant 0 : index
    %9 = vector.load %arg4[%c0_6, %c0_7] : memref<128x128xbf16, #tpu.memory_space<vmem>>, vector<128x128xbf16>
    %cst_8 = arith.constant dense<0.000000e+00> : vector<16x128xf32>
    %10 = tpu.matmul %8, %9, %cst_8 {dimension_numbers = #tpu.dot_dimension_numbers<[1], [0], [0], [1], [0, 0, 1, 1], [], []>} : vector<16x128xbf16>, vector<128x128xbf16>, vector<16x128xf32> -> vector<16x128xf32>
    %c0_9 = arith.constant 0 : index
    %c0_10 = arith.constant 0 : index
    %11 = vector.load %arg5[%c0_9, %c0_10] : memref<1x128xf32, #tpu.memory_space<vmem>>, vector<1x128xf32>
    %12 = vector.broadcast %11 : vector<1x128xf32> to vector<16x128xf32>
    %13 = arith.addf %10, %12 : vector<16x128xf32>
    %cst_11 = arith.constant dense<0xFF800000> : vector<16xf32>
    %14 = vector.multi_reduction <maximumf>, %13, %cst_11 [1] : vector<16x128xf32> to vector<16xf32>
    %15 = vector.shape_cast %14 : vector<16xf32> to vector<16x1xf32>
    %16 = vector.broadcast %15 : vector<16x1xf32> to vector<16x128xf32>
    %17 = arith.subf %13, %16 : vector<16x128xf32>
    %18 = math.exp %17 : vector<16x128xf32>
    %cst_12 = arith.constant dense<0.000000e+00> : vector<16xf32>
    %19 = vector.multi_reduction <add>, %18, %cst_12 [1] : vector<16x128xf32> to vector<16xf32>
    %20 = vector.shape_cast %19 : vector<16xf32> to vector<16x1xf32>
    %21 = vector.broadcast %20 : vector<16x1xf32> to vector<16x128xf32>
    %22 = arith.divf %18, %21 : vector<16x128xf32>
    %23 = arith.truncf %22 : vector<16x128xf32> to vector<16x128xbf16>
    %c0_13 = arith.constant 0 : index
    %c0_14 = arith.constant 0 : index
    %24 = vector.load %arg6[%c0_13, %c0_14] : memref<16x128xbf16, #tpu.memory_space<vmem>>, vector<16x128xbf16>
    tpu.vector_store %arg6[%c0_13, %c0_14], %23 {strides = array<i32>} : memref<16x128xbf16, #tpu.memory_space<vmem>>, vector<16x128xbf16>,
    return
  }
  func.func @transform_0(%arg0: i32) -> (i32, i32) {
    %c0_i32 = arith.constant 0 : i32
    %c0_i32_0 = arith.constant 0 : i32
    return %arg0, %c0_i32 : i32, i32
  }
  func.func @transform_1(%arg0: i32) -> (i32, i32) {
    %c0_i32 = arith.constant 0 : i32
    %c0_i32_0 = arith.constant 0 : i32
    %c0_i32_1 = arith.constant 0 : i32
    return %c0_i32, %c0_i32_0 : i32, i32
  }
  func.func @transform_2(%arg0: i32) -> (i32, i32) {
    %c0_i32 = arith.constant 0 : i32
    %c0_i32_0 = arith.constant 0 : i32
    %c0_i32_1 = arith.constant 0 : i32
    return %c0_i32, %c0_i32_0 : i32, i32
  }
  func.func @transform_3(%arg0: i32) -> (i32, i32) {
    %c0_i32 = arith.constant 0 : i32
    %c0_i32_0 = arith.constant 0 : i32
    %c0_i32_1 = arith.constant 0 : i32
    return %c0_i32, %c0_i32_0 : i32, i32
  }
  func.func @transform_4(%arg0: i32) -> (i32, i32) {
    %c0_i32 = arith.constant 0 : i32
    %c0_i32_0 = arith.constant 0 : i32
    %c0_i32_1 = arith.constant 0 : i32
    return %c0_i32, %c0_i32_0 : i32, i32
  }
  func.func @transform_5(%arg0: i32) -> (i32, i32) {
    %c0_i32 = arith.constant 0 : i32
    %c0_i32_0 = arith.constant 0 : i32
    return %arg0, %c0_i32 : i32, i32
  }
}

</mosaic_0001>

<bundles_post_ra>
// kernel: actor_forward.1
= control target key start
LH: loop header
LB: loop body
LE: loop exit
PB: predicated region body
PF: predicated region fallthrough
CT: control target
= control target key end

     0   :  { %10 = vsyncpa [#allocation3], 0  ;;  %s369_s18 = smov [#allocation2]   ;;  %s434_s0 = inlined_call_operand.vmem [shape: bf16[16,32], index: 0, kind: input, shape index: {}]   ;;  %s435_s1 = inlined_call_operand.vmem [shape: bf16[32,128], index: 1, kind: input, shape index: {}]   ;;  %s436_s2 = inlined_call_operand.vmem [shape: f32[1,128], index: 2, kind: input, shape index: {}]   ;;  %s437_s3 = inlined_call_operand.hbm [shape: bf16[128,128], index: 3, kind: input, shape index: {}]   ;;  %s438_s4 = inlined_call_operand.vmem [shape: f32[1,128], index: 4, kind: input, shape index: {}]   ;;  %s439_s5 = inlined_call_operand.vmem [shape: bf16[16,128], index: 5, kind: output, shape index: {}]  }
   0x1   :  { %s22_s19 = sshll.u32 %s369_s18, 4  ;;  %s345_s22 = scalar_lea.hbm %s437_s3, 1024  ;;  %s23_s19 = int_to_ptr.vmem [resolvable:$true] %s22_s19 }
   0x2   :  { %p346_p0 = scmp.ne.s32.totalorder %s437_s3, %s345_s22  ;;  %p349_p1 = scmp.lt.u32.totalorder %s345_s22, %s437_s3 }
   0x4   :  { %p351_p2 = pnand %p349_p1, %p346_p0 }
   0x6   :  { %354 = shalt.err (!%p351_p2)
}
   0x7   :  { %s355_s27 = scalar_lea.vmem %s23_s19, 1024  ;;  %p360_p4 = scmp.lt.s32.totalorder %s23_s19, %s23_s19 }
   0x8   :  { %p356_p3 = scmp.ne.s32.totalorder %s23_s19, %s355_s27  ;;  %p361_p5 = scmp.lt.s32.totalorder %s355_s27, %s355_s27 }
   0xa   :  { %p362_p6 = por %p361_p5, %p360_p4 }
   0xc   :  { %p363_p7 = pnand %p362_p6, %p356_p3 }
   0xe   :  { %366 = shalt.err (!%p363_p7)
}
   0xf   :  { %s370_s28 = smov 64   ;;  %s371_s29 = smov 4  }
  0x10   :  { %28 = dma.hbm_to_vmem [thread:$0]  %s437_s3, 1024, %s23_s19, [#allocation3], %s370_s28, %s370_s28, %s371_s29  }
  0x11   :  { %367 = dma.done.wait [#allocation3], 1024  }
  0x12   :  { %368 = vsyncadd [#allocation3], 4294966272  ;;  %v372_v0 = vmov 0.0   ;;  %vm373_vm0 = vmmov 0   ;;  %v326_v1 = vld [vmem:[%s435_s1] sm:$0xff]   ;;  %v327_v2 = vld [vmem:[%s435_s1 + $0x8] sm:$0xff]  }
  0x13   :  { %293 = vmatprep.subr.bf16.mxu0 %v372_v0  ;;  %297 = vmatprep.mubr.msk.bf16.mxu0 %vm373_vm0, %v372_v0  ;;  %v329_v3 = vld [vmem:[#allocation2] sm:$0xff]   ;;  %v328_v4 = vld [vmem:[%s434_s0] sm:$0xff]   ;;  %v330_v5 = vld [vmem:[#allocation2 + $0x8] sm:$0xff]   ;;  %vm65_vm1 = vcmask 261120  }
  0x14   :  { %301 = vmatprep.subr.bf16.mxu1 %v372_v0  ;;  %317 = vmatprep.mubr.msk.bf16.mxu1 %vm373_vm0, %v372_v0  ;;  %v331_v6 = vld [vmem:[#allocation2 + $0x10] sm:$0xff]   ;;  %v332_v7 = vld [vmem:[#allocation2 + $0x18] sm:$0xff]   ;;  %v333_v8 = vld [vmem:[#allocation2 + $0x20] sm:$0xff]  }
  0x15   :  { %294 = vmatpush3.bf16.msra.mxu0 %v326_v1  ;;  %302 = vmatpush3.bf16.msra.mxu1 %v329_v3  ;;  %v334_v9 = vld [vmem:[#allocation2 + $0x28] sm:$0xff]   ;;  %v335_v10 = vld [vmem:[#allocation2 + $0x30] sm:$0xff]   ;;  %v336_v11 = vld [vmem:[#allocation2 + $0x38] sm:$0xff]  }
  0x16   :  { %295 = vmatprep.subr.bf16.mxu0 %v372_v0  ;;  %303 = vmatprep.subr.bf16.mxu1 %v372_v0  ;;  %v258_v12 = vld [vmem:[%s436_s2] ss:$0 sm:$0xff] }
  0x17   :  { %v263_v22 = vld [vmem:[%s438_s4] ss:$0 sm:$0xff] }
  0x19   :  { %296 = vmatpush3.bf16.msra.mxu0 %v327_v2  ;;  %304 = vmatpush3.bf16.msra.mxu1 %v330_v5 }
  0x1a   :  { %305 = vmatprep.subr.bf16.mxu1 %v372_v0 }
  0x1c   :  { %298 = vmatmul.mubr.msk.bf16.vlgmr.msra.gmra.mrb[0].mxu0 %vm65_vm1, %v328_v4 }
  0x1d   :  { %306 = vmatpush3.bf16.msra.mxu1 %v331_v6 }
  0x1e   :  { %307 = vmatprep.subr.bf16.mxu1 %v372_v0 }
  0x21   :  { %308 = vmatpush3.bf16.msra.mxu1 %v332_v7 }
  0x22   :  { %309 = vmatprep.subr.bf16.mxu1 %v372_v0 }
  0x25   :  { %310 = vmatpush3.bf16.msra.mxu1 %v333_v8 }
  0x26   :  { %311 = vmatprep.subr.bf16.mxu1 %v372_v0 }
  0x29   :  { %312 = vmatpush3.bf16.msra.mxu1 %v334_v9 }
  0x2a   :  { %313 = vmatprep.subr.bf16.mxu1 %v372_v0 }
  0x2d   :  { %314 = vmatpush3.bf16.msra.mxu1 %v335_v10 }
  0x2e   :  { %315 = vmatprep.subr.bf16.mxu1 %v372_v0 }
  0x31   :  { %316 = vmatpush3.bf16.msra.mxu1 %v336_v11 }
  0xef   :  { %v103_v13 = vpop.f32.mrb[0].mxu0 }
  0xf0   :  { %v104_v14 = vadd.f32 %v258_v12, %v103_v13  ;;  %v299_v15 = vpop.f32.mrb[1].mxu0 }
  0xf1   :  { %v106_v16 = vpop.f32.mrb[2].mxu0 }
  0xf2   :  { %v107_v17 = vadd.f32 %v258_v12, %v106_v16  ;;  %v300_v18 = vpop.f32.mrb[3].mxu0  ;;  %v110_v19 = vmax.f32 %v104_v14, 0.0 }
  0xf4   :  { %v111_v20 = vmax.f32 %v107_v17, 0.0 }
  0xf6   :  { %v112_v21 = vpack.c.bf16 %v111_v20, %v110_v19 }
  0xf8   :  { %318 = vmatmul.mubr.bf16.vlgmr.msra.gmra.mrb[0].mxu1 %v112_v21 }
 0x1cb   :  { %v218_v23 = vpop.f32.mrb[0].mxu1 }
 0x1cc   :  { %v219_v24 = vadd.f32 %v263_v22, %v218_v23  ;;  %v319_v25 = vpop.f32.mrb[1].mxu1 }
 0x1cd   :  { %v221_v26 = vpop.f32.mrb[2].mxu1 }
 0x1ce   :  { %225 = vmax.xlane.f32.xlu0 %v219_v24  ;;  %v320_v27 = vpop.f32.mrb[3].mxu1  ;;  %v222_v28 = vadd.f32 %v263_v22, %v221_v26 }
 0x1d2   :  { %227 = vmax.xlane.f32.xlu0 %v222_v28 }
 0x25b   :  { %v226_v29 = vpop.xlane.xlu0 %225 }
 0x25c   :  { %v229_v30 = vsub.f32 %v219_v24, %v226_v29 }
 0x25e   :  { %v231_v31 = vmul.f32 1.442695, %v229_v30 }
 0x25f   :  { %v228_v32 = vpop.xlane.xlu0 %227 }
 0x260   :  { %337 = vpow2.f32 %v231_v31  ;;  %v230_v33 = vsub.f32 %v222_v28, %v228_v32 }
 0x262   :  { %v233_v34 = vmul.f32 1.442695, %v230_v33 }
 0x264   :  { %339 = vpow2.f32 %v233_v34 }
 0x26a   :  { %v338_v35 = vpop.eup %337 }
 0x26b   :  { %235 = vadd.xlane.f32.xlu1 %v338_v35 }
 0x26e   :  { %v340_v36 = vpop.eup %339 }
 0x26f   :  { %237 = vadd.xlane.f32.xlu1 %v340_v36 }
 0x2f8   :  { %v236_v37 = vpop.xlane.xlu1 %235 }
 0x2f9   :  { %341 = vrcp.f32 %v236_v37 }
 0x2fc   :  { %v238_v38 = vpop.xlane.xlu1 %237 }
 0x2fd   :  { %343 = vrcp.f32 %v238_v38 }
 0x303   :  { %v342_v39 = vpop.eup %341 }
 0x304   :  { %v240_v41 = vmul.f32 %v342_v39, %v338_v35 }
 0x307   :  { %v344_v40 = vpop.eup %343 }
 0x308   :  { %v242_v42 = vmul.f32 %v344_v40, %v340_v36 }
 0x30a   :  { %v279_v43 = vpack.c.bf16 %v242_v42, %v240_v41 }
 0x30c   :  { %280 = vst [vmem:[%s439_s5] sm:$0xff] %v279_v43  }
 0x30d   :  { %257 = vsyncpa [#allocation3], 1 }

</bundles_post_ra>
